<compile_context>
chip_gen: v7x
topology: tpu7x:2x2x1
jax: 0.10.0
libtpu: 0.0.40
codegen_flags: <defaults>
</compile_context>

<pallas_src>
import functools

import jax
import jax.numpy as jnp
import numpy as np
from jax.experimental import pallas as pl
from jax.experimental.pallas import tpu as pltpu

HID = 10        # logical hidden width
HID_PAD = 16    # padded to f32 sublane multiple (8)

# Packed-parameter column layout inside the (16, 8) f32 slab.
_COL_W1_0, _COL_W1_1, _COL_B1, _COL_B2, _COL_B3, _COL_W4, _COL_B4 = range(7)


def mlp_kernel(x_ref, wmx_ref, pv_ref, o_ref):
    x = x_ref[...]                                    # (2, bt) f32, batch on lanes
    pv = pv_ref[...]                                  # (16, 8) f32 packed params

    w1c0 = pv[:, _COL_W1_0:_COL_W1_0 + 1]             # (16, 1)
    w1c1 = pv[:, _COL_W1_1:_COL_W1_1 + 1]
    b1 = pv[:, _COL_B1:_COL_B1 + 1]
    b2 = pv[:, _COL_B2:_COL_B2 + 1]
    b3 = pv[:, _COL_B3:_COL_B3 + 1]
    w4 = pv[:, _COL_W4:_COL_W4 + 1]
    b4 = pv[0:1, _COL_B4:_COL_B4 + 1]                 # (1, 1)

    # Layer 1 (in_features=2): VPU broadcast FMA — no MXU push for K=2.
    z = jnp.maximum(w1c0 * x[0:1, :] + w1c1 * x[1:2, :] + b1, 0.0)  # (16, bt) f32

    # Layers 2 & 3 (10x10, zero-padded to 16x16): bf16 MXU matmuls, f32 accum.
    w2 = wmx_ref[:, 0:HID_PAD]                        # (16, 16) bf16
    w3 = wmx_ref[:, HID_PAD:2 * HID_PAD]              # (16, 16) bf16
    z = jnp.dot(w2, z.astype(jnp.bfloat16),
                preferred_element_type=jnp.float32) + b2
    z = jnp.maximum(z, 0.0)                           # (16, bt) f32
    z = jnp.dot(w3, z.astype(jnp.bfloat16),
                preferred_element_type=jnp.float32) + b3
    z = jnp.maximum(z, 0.0)                           # (16, bt) f32

    # Layer 4 (out_features=1): VPU multiply + sublane reduction -> (1, bt).
    z = jnp.sum(w4 * z, axis=0, keepdims=True) + b4
    o_ref[...] = jnp.maximum(z, 0.0).astype(o_ref.dtype)  # lane-dense output


def _round_up(a, m):
    return ((a + m - 1) // m) * m


def _choose_tiles(n, *, bt_max=32768, min_split=8192):
    """Pick (batch_tile, padded_total) for a batch of n rows."""
    n_pad = _round_up(max(n, 1), 128)
    k = pl.cdiv(n_pad, bt_max)
    # Prefer >=2 grid steps (both v7x TensorCores) only when each half-tile
    # still amortizes the ~0.35us per-step overhead; never split tiny batches.
    if k == 1 and n_pad >= 2 * min_split:
        k = 2
    bt = _round_up(pl.cdiv(n_pad, k), 128)
    steps = pl.cdiv(n_pad, bt)
    return bt, bt * steps


def _pack_params(params):
    """Pack PyTorch-layout params (w{i}:(out,in), b{i}:(out,)) into two slabs."""
    f32 = lambda a: jnp.asarray(a, jnp.float32)

    pv = jnp.zeros((HID_PAD, 8), jnp.float32)
    pv = pv.at[:HID, _COL_W1_0:_COL_W1_1 + 1].set(f32(params["w1"]))      # (10, 2)
    pv = pv.at[:HID, _COL_B1].set(f32(params["b1"]))
    pv = pv.at[:HID, _COL_B2].set(f32(params["b2"]))
    pv = pv.at[:HID, _COL_B3].set(f32(params["b3"]))
    pv = pv.at[:HID, _COL_W4].set(f32(params["w4"]).reshape(HID))         # (1,10)->(10,)
    pv = pv.at[0, _COL_B4].set(f32(params["b4"]).reshape(()))             # scalar

    wmx = jnp.zeros((HID_PAD, 2 * HID_PAD), jnp.float32)
    wmx = wmx.at[:HID, 0:HID].set(f32(params["w2"]))
    wmx = wmx.at[:HID, HID_PAD:HID_PAD + HID].set(f32(params["w3"]))
    return wmx.astype(jnp.bfloat16), pv


@functools.partial(jax.jit, static_argnames=("feature_major",))
def circle_model_v1_forward(x, params, *, feature_major=False):
    """Forward pass of CircleModelv1.

    x: (N, 2) float32 (PyTorch layout) or (2, N) if feature_major=True.
    params: dict with PyTorch-layout tensors w{i}:(out,in), b{i}:(out,).
    Returns (N, 1) float32 (trailing ReLU included, as in the reference module).
    """
    # TODO(synk): for large-N production use, have the caller produce the
    # feature-major (2, N) buffer directly so the pad+transpose HBM pass below
    # disappears entirely.
    x = jnp.asarray(x, jnp.float32)
    if feature_major:
        F, N = x.shape
    else:
        N, F = x.shape
    assert F == 2

    bt, n_total = _choose_tiles(N)
    grid = (n_total // bt,)

    x_t = jnp.zeros((2, n_total), jnp.float32)
    if feature_major:
        x_t = x_t.at[:, :N].set(x)
    else:
        x_t = x_t.at[:, :N].set(x.T)

    wmx, pv = _pack_params(params)

    out_t = pl.pallas_call(
        mlp_kernel,
        out_shape=jax.ShapeDtypeStruct((1, n_total), jnp.float32),
        grid_spec=pltpu.PrefetchScalarGridSpec(
            num_scalar_prefetch=0,
            grid=grid,
            in_specs=[
                pl.BlockSpec((2, bt), lambda i: (0, i)),          # x tile
                pl.BlockSpec(wmx.shape, lambda i: (0, 0)),        # bf16 matmul weights
                pl.BlockSpec(pv.shape, lambda i: (0, 0)),         # packed f32 params
            ],
            out_specs=pl.BlockSpec((1, bt), lambda i: (0, i)),    # lane-dense out
        ),
        compiler_params=pltpu.CompilerParams(
            dimension_semantics=("parallel",)),
    )(x_t, wmx, pv)

    return out_t[0, :N].reshape(N, 1)


def init_params(key):
    """PyTorch-style Linear init: U(-1/sqrt(fan_in), 1/sqrt(fan_in)), W:(out,in)."""
    dims = [(10, 2), (10, 10), (10, 10), (1, 10)]   # (out_features, in_features)
    params = {}
    keys = jax.random.split(key, 2 * len(dims))
    for li, (fan_out, fan_in) in enumerate(dims, start=1):
        bound = 1.0 / np.sqrt(fan_in)
        params[f"w{li}"] = jax.random.uniform(
            keys[2 * (li - 1)], (fan_out, fan_in),
            minval=-bound, maxval=bound, dtype=jnp.float32)
        params[f"b{li}"] = jax.random.uniform(
            keys[2 * (li - 1) + 1], (fan_out,),
            minval=-bound, maxval=bound, dtype=jnp.float32)
    return params


def reference_forward(x, params):
    # Faithful to the nn.Module: ReLU after every layer, including the last.
    z = jnp.asarray(x, jnp.float32)
    for li in range(1, 5):
        z = jnp.maximum(z @ params[f"w{li}"].T + params[f"b{li}"], 0.0)
    return z


if __name__ == "__main__":
    key = jax.random.PRNGKey(0)
    pkey, xkey = jax.random.split(key)

    params = init_params(pkey)

    # Small, deliberately ragged batch (not a multiple of 128) to exercise the
    # pad-and-slice path; with the new tiling it runs as a single grid step.
    N = 200
    x = jax.random.normal(xkey, (N, 2), dtype=jnp.float32)

    out = circle_model_v1_forward(x, params)
    out = jax.block_until_ready(out)

    ref = reference_forward(x, params)
    # Looser tolerance: hidden-layer matmuls use bf16 operands on the MXU
    # (f32 accumulation) — a deliberate precision/perf trade.
    np.testing.assert_allclose(np.asarray(out), np.asarray(ref),
                               rtol=3e-2, atol=3e-2)
    assert out.shape == (N, 1)

    print("KERNEL_OK")
</pallas_src>

<mosaic_0001>
module attributes {stable_mosaic.version = 11 : i64} {
  func.func @mlp_kernel(%arg0: i32, %arg1: memref<2x256xf32, #tpu.memory_space<vmem>>, %arg2: memref<16x32xbf16, #tpu.memory_space<vmem>>, %arg3: memref<16x8xf32, #tpu.memory_space<vmem>>, %arg4: memref<1x256xf32, #tpu.memory_space<vmem>>) attributes {dimension_semantics = [#tpu.dimension_semantics<parallel>], iteration_bounds = array<i64: 1>, scalar_prefetch = 0 : i64, scratch_operands = 0 : i64, tpu.core_type = #tpu.core_type<tc>, window_params = [{transform_indices = @transform_0, window_bounds = array<i64: 2, 256>}, {pipeline_mode = #tpu.pipeline_mode<synchronous>, transform_indices = @transform_1, window_bounds = array<i64: 16, 32>}, {pipeline_mode = #tpu.pipeline_mode<synchronous>, transform_indices = @transform_2, window_bounds = array<i64: 16, 8>}, {transform_indices = @transform_3, window_bounds = array<i64: 1, 256>}]} {
    %c0 = arith.constant 0 : index
    %c0_0 = arith.constant 0 : index
    %0 = vector.load %arg1[%c0, %c0_0] : memref<2x256xf32, #tpu.memory_space<vmem>>, vector<2x256xf32>
    %c0_1 = arith.constant 0 : index
    %c0_2 = arith.constant 0 : index
    %1 = vector.load %arg3[%c0_1, %c0_2] : memref<16x8xf32, #tpu.memory_space<vmem>>, vector<16x8xf32>
    %2 = vector.extract_strided_slice %1 {offsets = [0, 0], sizes = [16, 1], strides = [1, 1]} : vector<16x8xf32> to vector<16x1xf32>
    %3 = vector.extract_strided_slice %1 {offsets = [0, 1], sizes = [16, 1], strides = [1, 1]} : vector<16x8xf32> to vector<16x1xf32>
    %4 = vector.extract_strided_slice %1 {offsets = [0, 2], sizes = [16, 1], strides = [1, 1]} : vector<16x8xf32> to vector<16x1xf32>
    %5 = vector.extract_strided_slice %1 {offsets = [0, 3], sizes = [16, 1], strides = [1, 1]} : vector<16x8xf32> to vector<16x1xf32>
    %6 = vector.extract_strided_slice %1 {offsets = [0, 4], sizes = [16, 1], strides = [1, 1]} : vector<16x8xf32> to vector<16x1xf32>
    %7 = vector.extract_strided_slice %1 {offsets = [0, 5], sizes = [16, 1], strides = [1, 1]} : vector<16x8xf32> to vector<16x1xf32>
    %8 = vector.extract_strided_slice %1 {offsets = [0, 6], sizes = [1, 1], strides = [1, 1]} : vector<16x8xf32> to vector<1x1xf32>
    %9 = vector.extract_strided_slice %0 {offsets = [0, 0], sizes = [1, 256], strides = [1, 1]} : vector<2x256xf32> to vector<1x256xf32>
    %10 = vector.broadcast %2 : vector<16x1xf32> to vector<16x256xf32>
    %11 = vector.broadcast %9 : vector<1x256xf32> to vector<16x256xf32>
    %12 = arith.mulf %10, %11 : vector<16x256xf32>
    %13 = vector.extract_strided_slice %0 {offsets = [1, 0], sizes = [1, 256], strides = [1, 1]} : vector<2x256xf32> to vector<1x256xf32>
    %14 = vector.broadcast %3 : vector<16x1xf32> to vector<16x256xf32>
    %15 = vector.broadcast %13 : vector<1x256xf32> to vector<16x256xf32>
    %16 = arith.mulf %14, %15 : vector<16x256xf32>
    %17 = arith.addf %12, %16 : vector<16x256xf32>
    %18 = vector.broadcast %4 : vector<16x1xf32> to vector<16x256xf32>
    %19 = arith.addf %17, %18 : vector<16x256xf32>
    %cst = arith.constant 0.000000e+00 : f32
    %20 = vector.broadcast %cst : f32 to vector<16x256xf32>
    %21 = arith.maximumf %19, %20 : vector<16x256xf32>
    %c0_3 = arith.constant 0 : index
    %c0_4 = arith.constant 0 : index
    %22 = vector.load %arg2[%c0_3, %c0_4] : memref<16x32xbf16, #tpu.memory_space<vmem>>, vector<16x16xbf16>
    %c0_5 = arith.constant 0 : index
    %c16 = arith.constant 16 : index
    %23 = vector.load %arg2[%c0_5, %c16] : memref<16x32xbf16, #tpu.memory_space<vmem>>, vector<16x16xbf16>
    %24 = arith.truncf %21 : vector<16x256xf32> to vector<16x256xbf16>
    %cst_6 = arith.constant dense<0.000000e+00> : vector<16x256xf32>
    %25 = tpu.matmul %22, %24, %cst_6 {dimension_numbers = #tpu.dot_dimension_numbers<[1], [0], [0], [1], [0, 0, 1, 1], [], []>} : vector<16x16xbf16>, vector<16x256xbf16>, vector<16x256xf32> -> vector<16x256xf32>
    %26 = vector.broadcast %5 : vector<16x1xf32> to vector<16x256xf32>
    %27 = arith.addf %25, %26 : vector<16x256xf32>
    %cst_7 = arith.constant 0.000000e+00 : f32
    %28 = vector.broadcast %cst_7 : f32 to vector<16x256xf32>
    %29 = arith.maximumf %27, %28 : vector<16x256xf32>
    %30 = arith.truncf %29 : vector<16x256xf32> to vector<16x256xbf16>
    %cst_8 = arith.constant dense<0.000000e+00> : vector<16x256xf32>
    %31 = tpu.matmul %23, %30, %cst_8 {dimension_numbers = #tpu.dot_dimension_numbers<[1], [0], [0], [1], [0, 0, 1, 1], [], []>} : vector<16x16xbf16>, vector<16x256xbf16>, vector<16x256xf32> -> vector<16x256xf32>
    %32 = vector.broadcast %6 : vector<16x1xf32> to vector<16x256xf32>
    %33 = arith.addf %31, %32 : vector<16x256xf32>
    %cst_9 = arith.constant 0.000000e+00 : f32
    %34 = vector.broadcast %cst_9 : f32 to vector<16x256xf32>
    %35 = arith.maximumf %33, %34 : vector<16x256xf32>
    %36 = vector.broadcast %7 : vector<16x1xf32> to vector<16x256xf32>
    %37 = arith.mulf %36, %35 : vector<16x256xf32>
    %cst_10 = arith.constant dense<0.000000e+00> : vector<256xf32>
    %38 = vector.multi_reduction <add>, %37, %cst_10 [0] : vector<16x256xf32> to vector<256xf32>
    %39 = vector.shape_cast %38 : vector<256xf32> to vector<1x256xf32>
    %40 = vector.broadcast %8 : vector<1x1xf32> to vector<1x256xf32>
    %41 = arith.addf %39, %40 : vector<1x256xf32>
    %cst_11 = arith.constant 0.000000e+00 : f32
    %42 = vector.broadcast %cst_11 : f32 to vector<1x256xf32>
    %43 = arith.maximumf %41, %42 : vector<1x256xf32>
    %c0_12 = arith.constant 0 : index
    %c0_13 = arith.constant 0 : index
    %44 = vector.load %arg4[%c0_12, %c0_13] : memref<1x256xf32, #tpu.memory_space<vmem>>, vector<1x256xf32>
    tpu.vector_store %arg4[%c0_12, %c0_13], %43 {strides = array<i32>} : memref<1x256xf32, #tpu.memory_space<vmem>>, vector<1x256xf32>,
    return
  }
  func.func @transform_0(%arg0: i32) -> (i32, i32) {
    %c0_i32 = arith.constant 0 : i32
    %c0_i32_0 = arith.constant 0 : i32
    return %c0_i32, %arg0 : i32, i32
  }
  func.func @transform_1(%arg0: i32) -> (i32, i32) {
    %c0_i32 = arith.constant 0 : i32
    %c0_i32_0 = arith.constant 0 : i32
    %c0_i32_1 = arith.constant 0 : i32
    return %c0_i32, %c0_i32_0 : i32, i32
  }
  func.func @transform_2(%arg0: i32) -> (i32, i32) {
    %c0_i32 = arith.constant 0 : i32
    %c0_i32_0 = arith.constant 0 : i32
    %c0_i32_1 = arith.constant 0 : i32
    return %c0_i32, %c0_i32_0 : i32, i32
  }
  func.func @transform_3(%arg0: i32) -> (i32, i32) {
    %c0_i32 = arith.constant 0 : i32
    %c0_i32_0 = arith.constant 0 : i32
    return %c0_i32, %arg0 : i32, i32
  }
}

</mosaic_0001>

<bundles_post_ra>
// kernel: circle_model_v1_forward.1
= control target key start
LH: loop header
LB: loop body
LE: loop exit
PB: predicated region body
PF: predicated region fallthrough
CT: control target
= control target key end

     0   :  { %v315_v0 = vmov 1   ;;  %v316_v1 = vmov 0   ;;  %v317_v4 = vmov 2   ;;  %v318_v5 = vmov 3   ;;  %s319_s17 = smov 112   ;;  %s387_s2 = inlined_call_operand.vmem [shape: f32[16,8], index: 2, kind: input, shape index: {}]   ;;  %s388_s1 = inlined_call_operand.vmem [shape: bf16[16,32], index: 1, kind: input, shape index: {}]   ;;  %s389_s0 = inlined_call_operand.vmem [shape: f32[2,256], index: 0, kind: input, shape index: {}]   ;;  %s390_s3 = inlined_call_operand.vmem [shape: f32[1,256], index: 3, kind: output, shape index: {}]  }
   0x1   :  { %305 = vset.pattern.permute.xlu1 %v315_v0  ;;  %304 = vset.pattern.permute.xlu0 %v316_v1  ;;  %v347_v2 = vld [vmem:[%s387_s2] sm:$0xff]  ;;  %v354_v3 = vld [vmem:[%s387_s2 + $0x8] sm:$0xff]  ;;  %v29_v7 = vlaneseq  ;;  %vm118_vm0 = vcmask 130048   ;;  %v320_v50 = vmov 4   ;;  %v321_v51 = vmov 5  }
   0x2   :  { %52 = vperm.xlu1 %305, %v347_v2   ;;  %20 = vperm.xlu0 %304, %v347_v2   ;;  %v314_v6 = vld [vmem:[%s388_s1] sm:$0xff]   ;;  %v322_v52 = vmov 6  }
   0x3   :  { %154 = vmatprep.mubr.bf16.mxu0 %v316_v1  ;;  %216 = vmatprep.mubr.bf16.mxu1 %v316_v1  ;;  %v366_v8 = vshrl.u32 %v29_v7, 7  ;;  %v15_v13 = vld [vmem:[%s389_s0] sm:$0xf]  ;;  %vm285_vm1 = vcmp.lt.s32.totalorder %v29_v7, 256 }
   0x5   :  { %v61_v9 = vsub.s32 1, %v366_v8  ;;  %v65_v10 = vsub.s32 3, %v366_v8  ;;  %v31_v11 = vsub.s32 0, %v366_v8  ;;  %v35_v12 = vsub.s32 2, %v366_v8 }
   0x6   :  { %56 = vperm.xlu1 %305, %v354_v3   ;;  %25 = vperm.xlu0 %304, %v354_v3  }
   0x7   :  { %v62_v14 = vrot.slane %v15_v13, %v61_v9  ;;  %v66_v15 = vrot.slane %v15_v13, %v65_v10  ;;  %v32_v16 = vrot.slane %v15_v13, %v31_v11  ;;  %v36_v17 = vrot.slane %v15_v13, %v35_v12 }
   0x9   :  { %v72_v19 = vrot.slane %v62_v14, %v61_v9  ;;  %v76_v20 = vrot.slane %v66_v15, %v61_v9  ;;  %v42_v22 = vrot.slane %v32_v16, %v31_v11  ;;  %v46_v23 = vrot.slane %v36_v17, %v31_v11 }
   0xa   :  { %307 = vset.pattern.permute.xlu1 %v317_v4  ;;  %306 = vset.pattern.permute.xlu0 %v317_v4 }
   0xb   :  { %90 = vperm.xlu1 %307, %v354_v3   ;;  %86 = vperm.xlu0 %306, %v347_v2  }
   0xf   :  { %308 = vset.pattern.permute.xlu1 %v318_v5  ;;  %309 = vset.pattern.permute.xlu0 %v318_v5 }
  0x10   :  { %106 = vperm.xlu1 %308, %v347_v2   ;;  %110 = vperm.xlu0 %309, %v354_v3  }
  0x14   :  { %179 = vrot.lane.b32.xlu1 %v314_v6, %s319_s17  ;;  %311 = vset.pattern.permute.xlu0 %v320_v50 }
  0x15   :  { %310 = vset.pattern.permute.xlu1 %v320_v50  ;;  %176 = vperm.xlu0 %311, %v354_v3  }
  0x18   :  { %172 = vperm.xlu1 %310, %v347_v2  }
  0x19   :  { %313 = vset.pattern.permute.xlu0 %v322_v52 }
  0x1a   :  { %258 = vperm.xlu0 %313, %v347_v2  }
  0x1c   :  { %312 = vset.pattern.permute.xlu1 %v321_v51 }
  0x1d   :  { %232 = vperm.xlu1 %312, %v347_v2  }
  0x21   :  { %236 = vperm.xlu1 %312, %v354_v3  }
  0x81   :  { %v53_v18 = vpop.permute.xlu1 %52  ;;  %v21_v21 = vpop.permute.xlu0 %20 }
  0x82   :  { %v77_v24 = vmul.f32 %v72_v19, %v53_v18  ;;  %v78_v25 = vmul.f32 %v76_v20, %v53_v18  ;;  %v47_v26 = vmul.f32 %v42_v22, %v21_v21  ;;  %v48_v27 = vmul.f32 %v46_v23, %v21_v21 }
  0x84   :  { %v81_v36 = vadd.f32 %v77_v24, %v47_v26  ;;  %v82_v37 = vadd.f32 %v78_v25, %v48_v27 }
  0x85   :  { %v57_v28 = vpop.permute.xlu1 %56  ;;  %v26_v29 = vpop.permute.xlu0 %25 }
  0x86   :  { %v79_v30 = vmul.f32 %v72_v19, %v57_v28  ;;  %v80_v31 = vmul.f32 %v76_v20, %v57_v28  ;;  %v49_v32 = vmul.f32 %v42_v22, %v26_v29  ;;  %v50_v33 = vmul.f32 %v46_v23, %v26_v29 }
  0x88   :  { %v83_v34 = vadd.f32 %v79_v30, %v49_v32  ;;  %v84_v35 = vadd.f32 %v80_v31, %v50_v33 }
  0x8a   :  { %v91_v38 = vpop.permute.xlu1 %90  ;;  %v87_v39 = vpop.permute.xlu0 %86 }
  0x8b   :  { %v95_v40 = vadd.f32 %v91_v38, %v83_v34  ;;  %v96_v41 = vadd.f32 %v91_v38, %v84_v35  ;;  %v93_v42 = vadd.f32 %v87_v39, %v81_v36  ;;  %v94_v43 = vadd.f32 %v87_v39, %v82_v37 }
  0x8c   :  { %v323_v37 = vmov 1966171168  }
  0x8d   :  { %v99_v44 = vmax.f32 %v95_v40, 0.0  ;;  %v97_v45 = vmax.f32 %v93_v42, 0.0  ;;  %v98_v46 = vmax.f32 %v94_v43, 0.0  ;;  %v100_v47 = vmax.f32 %v96_v41, 0.0 }
  0x8e   :  { %v269_v38 = vunpack.c.l.s4 %v323_v37 }
  0x8f   :  { %v104_v48 = vpack.c.bf16 %v100_v47, %v98_v46  ;;  %v103_v49 = vpack.c.bf16 %v99_v44, %v97_v45  ;;  %v107_v53 = vpop.permute.xlu1 %106  ;;  %v111_v55 = vpop.permute.xlu0 %110 }
  0x90   :  { %v270_v44 = vunpack.c.0.s8 %v269_v38 }
  0x91   :  { %122 = vmatprep.subr.bf16.mxu0 %v104_v48 }
  0x92   :  { %123 = vmatpush1.bf16.msra.mxu0 %v103_v49  ;;  %v273_v49 = vsub.s32 %v270_v44, %v366_v8 }
  0x93   :  { %v180_v2 = vpop.permute.xlu1 %179 }
  0x94   :  { %v177_v11 = vpop.permute.xlu0 %176 }
  0x95   :  { %293 = vmatmul.mubr.msk.bf16.vlgmr.msra.gmra.mrb[0].mxu0 %vm118_vm0, %v314_v6 }
  0x97   :  { %v173_v3 = vpop.permute.xlu1 %172 }
  0x99   :  { %v259_v41 = vpop.permute.xlu0 %258 }
  0x9c   :  { %v233_v9 = vpop.permute.xlu1 %232 }
  0xa0   :  { %v237_v22 = vpop.permute.xlu1 %236 }
 0x168   :  { %v156_v54 = vpop.f32.mrb[0].mxu0 }
 0x169   :  { %v157_v56 = vadd.f32 %v156_v54, %v107_v53  ;;  %v158_v57 = vpop.f32.mrb[1].mxu0 }
 0x16a   :  { %v159_v58 = vadd.f32 %v158_v57, %v107_v53  ;;  %v160_v59 = vpop.f32.mrb[2].mxu0 }
 0x16b   :  { %v161_v60 = vadd.f32 %v160_v59, %v111_v55  ;;  %v162_v61 = vpop.f32.mrb[3].mxu0  ;;  %v165_v63 = vmax.f32 %v157_v56, 0.0 }
 0x16c   :  { %v163_v62 = vadd.f32 %v162_v61, %v111_v55  ;;  %v166_v1 = vmax.f32 %v159_v58, 0.0 }
 0x16d   :  { %v167_v0 = vmax.f32 %v161_v60, 0.0 }
 0x16e   :  { %v168_v4 = vmax.f32 %v163_v62, 0.0 }
 0x16f   :  { %v169_v5 = vpack.c.bf16 %v167_v0, %v165_v63 }
 0x170   :  { %v170_v6 = vpack.c.bf16 %v168_v4, %v166_v1 }
 0x172   :  { %184 = vmatprep.subr.bf16.mxu1 %v170_v6 }
 0x173   :  { %185 = vmatpush1.bf16.msra.mxu1 %v169_v5 }
 0x176   :  { %294 = vmatmul.mubr.msk.bf16.vlgmr.msra.gmra.mrb[0].mxu1 %vm118_vm0, %v180_v2 }
 0x249   :  { %v218_v10 = vpop.f32.mrb[0].mxu1 }
 0x24a   :  { %v219_v12 = vadd.f32 %v218_v10, %v173_v3  ;;  %v220_v13 = vpop.f32.mrb[1].mxu1 }
 0x24b   :  { %v221_v14 = vadd.f32 %v220_v13, %v173_v3  ;;  %v222_v15 = vpop.f32.mrb[2].mxu1 }
 0x24c   :  { %v227_v16 = vmax.f32 %v219_v12, 0.0  ;;  %v223_v17 = vadd.f32 %v222_v15, %v177_v11  ;;  %v224_v18 = vpop.f32.mrb[3].mxu1 }
 0x24d   :  { %v228_v19 = vmax.f32 %v221_v14, 0.0  ;;  %v225_v20 = vadd.f32 %v224_v18, %v177_v11 }
 0x24e   :  { %v229_v21 = vmax.f32 %v223_v17, 0.0  ;;  %v239_v24 = vmul.f32 %v233_v9, %v227_v16 }
 0x24f   :  { %v230_v23 = vmax.f32 %v225_v20, 0.0  ;;  %v240_v26 = vmul.f32 %v233_v9, %v228_v19 }
 0x250   :  { %v241_v25 = vmul.f32 %v237_v22, %v229_v21 }
 0x251   :  { %v242_v27 = vmul.f32 %v237_v22, %v230_v23 }
 0x252   :  { %v243_v28 = vadd.f32 %v241_v25, %v239_v24 }
 0x253   :  { %v250_v29 = vadd.f32 %v242_v27, %v240_v26 }
 0x254   :  { %v244_v30 = vrot.slane %v243_v28, 4 }
 0x255   :  { %v251_v31 = vrot.slane %v250_v29, 4 }
 0x256   :  { %v245_v32 = vadd.f32 %v244_v30, %v243_v28 }
 0x257   :  { %v252_v33 = vadd.f32 %v251_v31, %v250_v29 }
 0x258   :  { %v246_v34 = vrot.slane %v245_v32, 2 }
 0x259   :  { %v253_v35 = vrot.slane %v252_v33, 2 }
 0x25a   :  { %v247_v36 = vadd.f32 %v246_v34, %v245_v32 }
 0x25b   :  { %v254_v39 = vadd.f32 %v253_v35, %v252_v33 }
 0x25c   :  { %v248_v40 = vrot.slane %v247_v36, 1 }
 0x25d   :  { %v255_v42 = vrot.slane %v254_v39, 1 }
 0x25e   :  { %v249_v43 = vadd.f32 %v248_v40, %v247_v36 }
 0x25f   :  { %v256_v45 = vadd.f32 %v255_v42, %v254_v39 }
 0x260   :  { %v261_v46 = vadd.f32 %v259_v41, %v249_v43 }
 0x261   :  { %v262_v47 = vadd.f32 %v259_v41, %v256_v45 }
 0x262   :  { %v263_v48 = vmax.f32 %v261_v46, 0.0 }
 0x263   :  { %v264_v50 = vmax.f32 %v262_v47, 0.0 }
 0x265   :  { %v267_v51 = vcombine.low %v263_v48, %v264_v50 }
 0x267   :  { %v274_v52 = vrot.slane %v267_v51, %v273_v49 }
 0x269   :  { %v281_v53 = vrot.slane %v274_v52, %v273_v49 }
 0x26b   :  { %287 = vst.msk [vmem:[%s390_s3] sm:$0x3] %vm285_vm1, %v281_v53 }

</bundles_post_ra>
